<compile_context>
chip_gen: v7x
topology: tpu7x:2x2x1
jax: 0.10.0
libtpu: 0.0.40
codegen_flags: <defaults>
</compile_context>

<pallas_src>
import numpy as np
from typing import NamedTuple, Optional

import jax
import jax.numpy as jnp
from jax.experimental import pallas as pl
from jax.experimental.pallas import tpu as pltpu


# --------------------------------------------------------------------------
# Kernel
# --------------------------------------------------------------------------
def _mtp_kernel(x_ref, w_ref, o_ref):
    """One grid point = (vocab tile j, predictor i, H-chunk k).

    x_ref : VMEM [1, B, TK]   H-chunk of the hidden row (position i+1)
    w_ref : VMEM [1, TK, TV]  (H-chunk, vocab-tile) block of predictor i's weight
    o_ref : VMEM [B, TV]      lane-dense f32 output tile; accumulator across k
                              (its block index is constant along the k axis)
    """
    @pl.when(pl.program_id(2) == 0)
    def _():
        o_ref[...] = jnp.zeros_like(o_ref)

    o_ref[...] += jnp.dot(x_ref[0], w_ref[0],
                          preferred_element_type=jnp.float32)


# --------------------------------------------------------------------------
# One-time weight preparation (outside the hot path)
# --------------------------------------------------------------------------
class PreparedMTPWeights(NamedTuple):
    weights: jax.Array   # [num_tokens, H, Vp] in compute dtype, vocab pre-padded
    V: int               # true (unpadded) vocab size
    tile_v: int          # vocab tile width (multiple of 128)
    tile_k: int          # H chunk per reduction step (== H when no split)
    vmem_limit: int      # vmem_limit_bytes to pass to the compiler


def _vmem_capacity_bytes() -> int:
    """Per-TensorCore VMEM capacity with a generation-aware fallback."""
    kind = ""
    try:
        kind = jax.devices()[0].device_kind.lower()
    except Exception:
        pass
    cap = None
    try:
        info = pltpu.get_tpu_info()
        cap = getattr(info, "vmem_capacity_bytes", None)
    except Exception:
        pass
    if not cap:
        cap = (64 << 20) if "v7" in kind else (128 << 20)
    cap = int(cap)
    if "v7" in kind:
        # Be conservative in case the query reports per-chip rather than
        # per-TensorCore capacity on v7x.
        cap = min(cap, 64 << 20)
    return cap


def _pick_tiles(V: int, H: int, B: int, itemsize: int, budget: int):
    """Choose (tile_v, tile_k) for the double-buffered weight-streaming pipeline."""
    v_full = pl.cdiv(V, 128) * 128

    def fits(tk, tv):
        need = (2 * tk * tv * itemsize        # weight tile, double-buffered
                + 2 * B * tv * 4              # f32 output tile, double-buffered
                + 2 * B * tk * itemsize)      # x chunk, double-buffered
        return need <= budget

    def best_tile_v(tk):
        """128-multiple vocab tile minimizing padded weight traffic.

        Tie-break: largest tile (longest contiguous DMA rows, fewest steps)."""
        best_key, best_tv = None, None
        tv = 128
        while tv <= v_full:
            if fits(tk, tv):
                key = (pl.cdiv(v_full, tv) * tv, -tv)
                if best_key is None or key < best_key:
                    best_key, best_tv = key, tv
            tv += 128
        return best_tv

    tile_k = H
    tile_v = best_tile_v(H)

    # If VMEM forces a narrow vocab tile, split H onto a reduction grid axis
    # (keeps DMA rows long and output stores lane-dense) instead of shrinking
    # the vocab tile further.
    if tile_v is None or tile_v < min(1024, v_full):
        tk = H
        while tk % 2 == 0 and tk // 2 >= 512 and (tk // 2) % 128 == 0:
            tk //= 2
            cand = best_tile_v(tk)
            if cand is not None and (tile_v is None or cand > tile_v):
                tile_v, tile_k = cand, tk
            if tile_v is not None and tile_v >= min(2048, v_full):
                break

    if tile_v is None:
        # Degenerate budget; fall back to the smallest legal vocab tile.
        tile_v = 128
    return tile_v, tile_k


def prepare_mtp_weights(weights: jax.Array,
                        *,
                        compute_dtype=None,
                        tile_v: Optional[int] = None,
                        batch_hint: int = 8,
                        vmem_budget_frac: float = 0.75) -> PreparedMTPWeights:
    """Cast / pad / tile the [num_tokens, H, V] weights ONCE, at load time.

    The returned weights are already in the compute dtype and padded to a
    tile_v multiple, so the per-call forward does no full-weight HBM copies.
    """
    num_tokens, H, V = weights.shape
    if compute_dtype is not None:
        weights = weights.astype(compute_dtype)
    itemsize = jnp.dtype(weights.dtype).itemsize

    phys = _vmem_capacity_bytes()
    budget = int(phys * vmem_budget_frac)

    v_full = pl.cdiv(V, 128) * 128
    if tile_v is None:
        tile_v, tile_k = _pick_tiles(V, H, batch_hint, itemsize, budget)
    else:
        assert tile_v % 128 == 0, "tile_v must be a multiple of 128"
        tile_v = min(tile_v, v_full)   # guard: never pad more than one tile
        tile_k = H
    assert H % tile_k == 0

    Vp = pl.cdiv(V, tile_v) * tile_v
    if Vp > V:
        weights = jnp.pad(weights, ((0, 0), (0, 0), (0, Vp - V)))

    # VMEM accounting matches the actual (double-buffered) pipeline.
    vmem_need = (2 * tile_k * tile_v * itemsize
                 + 2 * batch_hint * tile_v * 4
                 + 2 * batch_hint * tile_k * itemsize)
    vmem_limit = max(vmem_need + (16 << 20), 64 << 20)
    vmem_limit = min(vmem_limit, phys * 92 // 100)
    vmem_limit = max(vmem_limit, vmem_need + (2 << 20))

    return PreparedMTPWeights(weights=weights, V=V, tile_v=tile_v,
                              tile_k=tile_k, vmem_limit=int(vmem_limit))


# --------------------------------------------------------------------------
# Forward
# --------------------------------------------------------------------------
def multi_token_predictor(hidden_states: jax.Array,
                          prep: PreparedMTPWeights) -> jax.Array:
    """hidden_states: [B, S, H]; prep: prepared weights (see prepare_mtp_weights).

    Returns logits [B, num_tokens, V] in float32 (matches torch.cat(logits, 1)).
    """
    B, S, H = hidden_states.shape
    num_tokens, Hw, Vp = prep.weights.shape
    assert Hw == H
    V = prep.V

    # Static validity: predictor i reads row i+1, valid iff i+1 < S.
    n_valid = min(num_tokens, S - 1)
    if n_valid <= 0:
        return jnp.zeros((B, num_tokens, V), jnp.float32)

    tile_v, tile_k = prep.tile_v, prep.tile_k
    assert Vp % tile_v == 0 and H % tile_k == 0
    n_vtiles = Vp // tile_v
    n_k = H // tile_k
    w_itemsize = jnp.dtype(prep.weights.dtype).itemsize

    # Tiny glue: contiguous slice of the needed rows as [n_valid, B, H] so each
    # predictor gets one (1, B, tile_k) block; cast of x is negligible.
    x_rows = jnp.transpose(hidden_states[:, 1:n_valid + 1, :], (1, 0, 2))
    x_rows = x_rows.astype(prep.weights.dtype)

    cost = pl.CostEstimate(
        flops=2 * B * n_valid * H * Vp,
        transcendentals=0,
        bytes_accessed=int(n_valid * H * Vp * w_itemsize          # weights
                           + n_vtiles * n_valid * B * H * w_itemsize  # x rows
                           + n_valid * B * Vp * 4))                # output

    out_flat = pl.pallas_call(
        _mtp_kernel,
        out_shape=jax.ShapeDtypeStruct((B, n_valid * Vp), jnp.float32),
        # Vocab-tile axis first so megacore (v7x) splits the weight stream even
        # when n_valid is 1; the H reduction axis is last and "arbitrary".
        grid=(n_vtiles, n_valid, n_k),
        in_specs=[
            pl.BlockSpec((1, B, tile_k), lambda j, i, k: (i, 0, k)),
            pl.BlockSpec((1, tile_k, tile_v), lambda j, i, k: (i, k, j)),
        ],
        out_specs=pl.BlockSpec((B, tile_v),
                               lambda j, i, k: (0, i * n_vtiles + j)),
        compiler_params=pltpu.CompilerParams(
            dimension_semantics=("parallel", "parallel", "arbitrary"),
            vmem_limit_bytes=prep.vmem_limit),
        cost_estimate=cost,
    )(x_rows, prep.weights)

    # Free row-major reshape; drop vocab padding if any.
    out = out_flat.reshape(B, n_valid, Vp)[:, :, :V]

    # Static zeros for predictors whose target position falls outside the seq.
    if n_valid < num_tokens:
        zeros = jnp.zeros((B, num_tokens - n_valid, V), jnp.float32)
        out = jnp.concatenate([out, zeros], axis=1)
    return out


# --------------------------------------------------------------------------
# Pure-JAX reference mirroring the PyTorch forward
# --------------------------------------------------------------------------
def _reference(hidden_states, weights):
    B, S, H = hidden_states.shape
    num_tokens, _, V = weights.shape
    outs = []
    for i in range(num_tokens):
        if i + 1 < S:
            outs.append(hidden_states[:, i + 1:i + 2, :] @ weights[i])
        else:
            outs.append(jnp.zeros((B, 1, V), jnp.float32))
    return jnp.concatenate(outs, axis=1)


if __name__ == "__main__":
    # Small config consistent with the module: n_embd=32, vocab_size=512,
    # multi_token_predict=2; batch=2, seq=8.
    B, S, H = 2, 8, 32
    V = 512
    NUM_TOKENS = 2

    key = jax.random.PRNGKey(0)
    k_x, k_w = jax.random.split(key)

    hidden_states = jax.random.normal(k_x, (B, S, H), dtype=jnp.float32)
    bound = 1.0 / np.sqrt(H)
    weights = jax.random.uniform(
        k_w, (NUM_TOKENS, H, V), dtype=jnp.float32, minval=-bound, maxval=bound)

    ref = _reference(hidden_states, weights)

    # Weight prep (dtype cast / vocab pad / tile sizing) happens ONCE here,
    # outside the per-call forward path.
    prep_f32 = prepare_mtp_weights(weights)
    logits = jax.block_until_ready(multi_token_predictor(hidden_states, prep_f32))
    np.testing.assert_allclose(np.asarray(logits), np.asarray(ref),
                               rtol=1e-5, atol=1e-5)
    assert logits.shape == (B, NUM_TOKENS, V)

    # bf16-weight path (halves weight HBM traffic, f32 accumulation): loose check.
    prep_bf16 = prepare_mtp_weights(weights, compute_dtype=jnp.bfloat16)
    logits_bf16 = jax.block_until_ready(
        multi_token_predictor(hidden_states, prep_bf16))
    np.testing.assert_allclose(np.asarray(logits_bf16), np.asarray(ref),
                               rtol=5e-2, atol=1e-1)

    # Short-sequence case: second predictor reads past the sequence -> zeros row.
    hs_short = hidden_states[:, :2, :]
    logits_short = jax.block_until_ready(
        multi_token_predictor(hs_short, prep_f32))
    np.testing.assert_allclose(np.asarray(logits_short),
                               np.asarray(_reference(hs_short, weights)),
                               rtol=1e-5, atol=1e-5)

    print("KERNEL_OK")
</pallas_src>

<mosaic_0001>
module attributes {stable_mosaic.version = 11 : i64} {
  func.func @_mtp_kernel(%arg0: i32, %arg1: i32, %arg2: i32, %arg3: memref<1x2x32xf32, #tpu.memory_space<vmem>>, %arg4: memref<1x32x512xf32, #tpu.memory_space<vmem>>, %arg5: memref<2x512xf32, #tpu.memory_space<vmem>>) attributes {dimension_semantics = [#tpu.dimension_semantics<parallel>, #tpu.dimension_semantics<parallel>, #tpu.dimension_semantics<arbitrary>], iteration_bounds = array<i64: 1, 2, 1>, scalar_prefetch = 0 : i64, scratch_operands = 0 : i64, tpu.core_type = #tpu.core_type<tc>, window_params = [{transform_indices = @transform_0, window_bounds = array<i64: 1, 2, 32>}, {transform_indices = @transform_1, window_bounds = array<i64: 1, 32, 512>}, {transform_indices = @transform_2, window_bounds = array<i64: 2, 512>}]} {
    %c0_i32 = arith.constant 0 : i32
    %0 = arith.cmpi eq, %arg2, %c0_i32 : i32
    %1 = arith.extui %0 : i1 to i32
    %c0_i32_0 = arith.constant 0 : i32
    %2 = arith.cmpi ne, %1, %c0_i32_0 : i32
    scf.if %2 {
      %cst_10 = arith.constant 0.000000e+00 : f32
      %11 = vector.broadcast %cst_10 : f32 to vector<2x512xf32>
      %c0_11 = arith.constant 0 : index
      %c0_12 = arith.constant 0 : index
      %12 = vector.load %arg5[%c0_11, %c0_12] : memref<2x512xf32, #tpu.memory_space<vmem>>, vector<2x512xf32>
      tpu.vector_store %arg5[%c0_11, %c0_12], %11 {strides = array<i32>} : memref<2x512xf32, #tpu.memory_space<vmem>>, vector<2x512xf32>,
    } else {
    }
    %c0 = arith.constant 0 : index
    %c0_1 = arith.constant 0 : index
    %3 = vector.load %arg5[%c0, %c0_1] : memref<2x512xf32, #tpu.memory_space<vmem>>, vector<2x512xf32>
    %c0_2 = arith.constant 0 : index
    %c0_3 = arith.constant 0 : index
    %c0_4 = arith.constant 0 : index
    %4 = vector.load %arg3[%c0_2, %c0_3, %c0_4] : memref<1x2x32xf32, #tpu.memory_space<vmem>>, vector<1x2x32xf32>
    %5 = vector.shape_cast %4 : vector<1x2x32xf32> to vector<2x32xf32>
    %c0_5 = arith.constant 0 : index
    %c0_6 = arith.constant 0 : index
    %c0_7 = arith.constant 0 : index
    %6 = vector.load %arg4[%c0_5, %c0_6, %c0_7] : memref<1x32x512xf32, #tpu.memory_space<vmem>>, vector<1x32x512xf32>
    %7 = vector.shape_cast %6 : vector<1x32x512xf32> to vector<32x512xf32>
    %cst = arith.constant dense<0.000000e+00> : vector<2x512xf32>
    %8 = tpu.matmul %5, %7, %cst {dimension_numbers = #tpu.dot_dimension_numbers<[1], [0], [0], [1], [0, 0, 1, 1], [], []>} : vector<2x32xf32>, vector<32x512xf32>, vector<2x512xf32> -> vector<2x512xf32>
    %9 = arith.addf %3, %8 : vector<2x512xf32>
    %c0_8 = arith.constant 0 : index
    %c0_9 = arith.constant 0 : index
    %10 = vector.load %arg5[%c0_8, %c0_9] : memref<2x512xf32, #tpu.memory_space<vmem>>, vector<2x512xf32>
    tpu.vector_store %arg5[%c0_8, %c0_9], %9 {strides = array<i32>} : memref<2x512xf32, #tpu.memory_space<vmem>>, vector<2x512xf32>,
    return
  }
  func.func @transform_0(%arg0: i32, %arg1: i32, %arg2: i32) -> (i32, i32, i32) {
    %c0_i32 = arith.constant 0 : i32
    %c0_i32_0 = arith.constant 0 : i32
    return %arg1, %c0_i32, %arg2 : i32, i32, i32
  }
  func.func @transform_1(%arg0: i32, %arg1: i32, %arg2: i32) -> (i32, i32, i32) {
    %c0_i32 = arith.constant 0 : i32
    return %arg1, %arg2, %arg0 : i32, i32, i32
  }
  func.func @transform_2(%arg0: i32, %arg1: i32, %arg2: i32) -> (i32, i32) {
    %c1_i32 = arith.constant 1 : i32
    %0 = arith.muli %arg1, %c1_i32 : i32
    %1 = arith.addi %0, %arg0 : i32
    %c0_i32 = arith.constant 0 : i32
    %c0_i32_0 = arith.constant 0 : i32
    return %c0_i32, %1 : i32, i32
  }
}

</mosaic_0001>

<bundles_post_ra>
// kernel: tpu_custom_call.1
= control target key start
LH: loop header
LB: loop body
LE: loop exit
PB: predicated region body
PF: predicated region fallthrough
CT: control target
= control target key end

     0   :  { %7 = vsyncpa [#allocation3], 0  ;;  %s1080_s0 = inlined_call_operand.hbm [shape: f32[2,2,32], index: 0, kind: input, shape index: {}]   ;;  %s1081_s1 = inlined_call_operand.hbm [shape: f32[2,32,512], index: 1, kind: input, shape index: {}]   ;;  %s1082_s2 = inlined_call_operand.hbm [shape: f32[2,1024], index: 2, kind: output, shape index: {}]  }
   0x1   :  { %9 = vsyncpa [#allocation3 + $0x1], 0 }
   0x2   :  { %10 = vsyncpa [#allocation6], 0 }
   0x3   :  { %12 = vsyncpa [#allocation6 + $0x1], 0 }
   0x4   :  { %13 = vsyncpa [#allocation4], 0 }
   0x5   :  { %15 = vsyncpa [#allocation4 + $0x1], 0  ;;  %s835_s9 = smov 0   ;;  %s837_s10 = smov 0  }
   0x6   :  { %s839_s11 = smov 0   ;;  %s841_s12 = smov 0  }
   0x7   :  { %s843_s13 = smov 0   ;;  %s845_s14 = smov 0  }
   0x8 LB: > { %s556_s15 = sadd.s32 4294967295, %s811_s14   ;;  %s557_s16 = sadd.s32 4294967294, %s811_s14   ;;  %s811_s14 = sphi %s845_s14, %s21_s14   ;;  %s807_s13 = sphi %s843_s13, %s1101_s13   ;;  %s803_s12 = sphi %s841_s12, %s1100_s12   ;;  %s799_s11 = sphi %s839_s11, %s1099_s11   ;;  %s795_s10 = sphi %s837_s10, %s1098_s10   ;;  %s791_s9 = sphi %s835_s9, %s1097_s9  }
   0x9   : > { %s36_s17 = sadd.s32 1, %s807_s13  ;;  %s49_s18 = sadd.s32 1, %s799_s11 }
   0xa   : > { %p38_p0 = scmp.ge.s32.totalorder %s36_s17, 2  ;;  %p56_p1 = scmp.ne.s32.totalorder %s799_s11, %s795_s10 }
   0xb   : > { %p57_p2 = scmp.eq.s32.totalorder %s811_s14, 0  ;;  %p62_p3 = scmp.ne.s32.totalorder %s795_s10, %s791_s9 }
   0xc   : > { %s1103_s17 = smov (%p38_p0, %s36_s17), 0  ;;  %p63_p5 = scmp.eq.s32.totalorder %s556_s15, 0 }
   0xd   : > { %p876_p4 = por %p57_p2, %p56_p1  ;;  %s44_s20 = ssub.s32 %s807_s13, %s1103_s17 }
   0xe   : > { %p118_p6 = scmp.eq.s32.totalorder %s556_s15, 1  ;;  %p47_p7 = scmp.eq.s32.totalorder %s44_s20, 0 }
   0xf   : > { %p882_p8 = por %p63_p5, %p62_p3  ;;  %p124_p10 = scmp.eq.s32.totalorder %s557_s16, 1 }
  0x10   : > { %p886_p9 = por %p118_p6, %p56_p1  ;;  %p611_p13 = scmp.lt.s32.totalorder %s811_s14, 2 }
  0x11   : > { %s1086_s21 = scalar_select %p882_p8, 1, 0 }
  0x12   : > { %s1087_s22 = scalar_select %p886_p9, 1, 0 }
  0x13   : > { %s891_s23 = scalar_select %p47_p7, %s799_s11, %s49_s18  }
  0x14   : > { %p893_p11 = por %p124_p10, %p62_p3  ;;  %s900_s25 = sand.u32 1, %s799_s11  }
  0x15   : > { %s560_s26 = sshll.u32 %s900_s25, 1  ;;  %s561_s27 = sshll.u32 %s807_s13, 5 }
  0x16   : > { %s1088_s24 = scalar_select %p893_p11, 1, 0 }
  0x17   : > { %s907_s30 = scalar_lea.hbm %s1080_s0, %s561_s27  ;;  %s148_s3 = scalar_lea.vmem [#allocation2], %s560_s26 }
  0x18   : > { %s156_s4 = sshll.u32 %s148_s3, 4  ;;  %p913_p0 = pnand %p611_p13, %p876_p4  ;;  %s909_s4 = int_to_ptr.vmem [resolvable:$true] %s156_s4 }
  0x19   : > { %s145_s6 = scalar_lea.sflag [#allocation3], %s900_s25  ;;  %s665_s7 = scalar_lea.hbm %s907_s30, 32 }
  0x1a   : > { %p666_p3 = scmp.ne.s32.totalorder %s907_s30, %s665_s7  ;;  %p667_p5 = pneg %p913_p0 }
  0x1b   : > { %s670_s16 = scalar_lea.hbm %s1080_s0, 64  ;;  %p671_p4 = scmp.lt.u32.totalorder %s907_s30, %s1080_s0 }
  0x1c   : > { %p668_p6 = pnand %p667_p5, %p666_p3  ;;  %p672_p10 = scmp.lt.u32.totalorder %s670_s16, %s665_s7 }
  0x1d   : > { %p674_p12 = scmp.lt.u32.totalorder %s665_s7, %s907_s30 }
  0x1e   : > { %p669_p7 = pneg %p668_p6  ;;  %p673_p13 = por %p672_p10, %p671_p4 }
  0x20   : > { %p675_p1 = por %p674_p12, %p673_p13 }
  0x22   : > { %p676_p2 = pnand %p675_p1, %p669_p7 }
  0x24   : > { %679 = shalt.err (!%p676_p2)
}
  0x25   : > { %s680_s20 = scalar_lea.vmem %s909_s4, 32  ;;  %s813_s26 = smov [#allocation2]  }
  0x26   : > { %p681_p3 = scmp.ne.s32.totalorder %s909_s4, %s680_s20  ;;  %s685_s27 = sshll.u32 %s813_s26, 4  ;;  %s686_s27 = int_to_ptr.vmem [resolvable:$false] %s685_s27 }
  0x27   : > { %s687_s28 = scalar_lea.vmem %s686_s27, 64  ;;  %p688_p9 = scmp.lt.s32.totalorder %s909_s4, %s686_s27 }
  0x28   : > { %p683_p6 = pnand %p681_p3, %p667_p5  ;;  %p689_p4 = scmp.lt.s32.totalorder %s687_s28, %s680_s20 }
  0x2a   : > { %p684_p11 = pneg %p683_p6  ;;  %p690_p10 = por %p689_p4, %p688_p9 }
  0x2c   : > { %p691_p12 = pnand %p690_p10, %p684_p11 }
  0x2e   : > { %694 = shalt.err (!%p691_p12)
}
  0x2f   : > { %603 = dma.hbm_to_vmem [thread:$0]  (!%p913_p0), %s907_s30, 32, %s909_s4, %s145_s6  }
  0x30   : > { %p1090_p1 = scmp.lt.s32.totalorder %s811_s14, 3  ;;  %p1091_p2 = scmp.ge.s32.totalorder %s811_s14, 1 }
  0x31   : > { %s562_s3 = sshll.u32 %s900_s25, 7  ;;  %s576_s7 = sshll.u32 %s807_s13, 11 }
  0x32   : > { %p949_p7 = pnand %p1091_p2, %p1090_p1  ;;  %s958_s16 = scalar_lea.hbm %s1081_s1, %s576_s7 }
  0x33   : > { %s167_s18 = scalar_lea.vmem [#allocation5], %s562_s3  ;;  %s164_s30 = scalar_lea.sflag [#allocation6], %s900_s25 }
  0x34   : > { %s179_s19 = sshll.u32 %s167_s18, 4  ;;  %s695_s4 = scalar_lea.hbm %s958_s16, 2048  ;;  %s960_s19 = int_to_ptr.vmem [resolvable:$true] %s179_s19 }
  0x35   : > { %p696_p9 = scmp.ne.s32.totalorder %s958_s16, %s695_s4  ;;  %s700_s26 = scalar_lea.hbm %s1081_s1, 4096 }
  0x36   : > { %p701_p3 = scmp.lt.u32.totalorder %s958_s16, %s1081_s1  ;;  %p702_p6 = scmp.lt.u32.totalorder %s700_s26, %s695_s4 }
  0x37   : > { %p698_p11 = pnand %p696_p9, %p667_p5  ;;  %p704_p10 = scmp.lt.u32.totalorder %s695_s4, %s958_s16 }
  0x38   : > { %p703_p4 = por %p702_p6, %p701_p3 }
  0x39   : > { %p699_p13 = pneg %p698_p11 }
  0x3a   : > { %p705_p12 = por %p704_p10, %p703_p4 }
  0x3c   : > { %p706_p1 = pnand %p705_p12, %p699_p13 }
  0x3e   : > { %709 = shalt.err (!%p706_p1)
}
  0x3f   : > { %s710_s3 = scalar_lea.vmem %s960_s19, 2048  ;;  %s814_s7 = smov [#allocation5]  }
  0x40   : > { %p711_p2 = scmp.ne.s32.totalorder %s960_s19, %s710_s3  ;;  %s715_s8 = sshll.u32 %s814_s7, 4  ;;  %s716_s8 = int_to_ptr.vmem [resolvable:$false] %s715_s8 }
  0x41   : > { %s717_s15 = scalar_lea.vmem %s716_s8, 4096  ;;  %p718_p8 = scmp.lt.s32.totalorder %s960_s19, %s716_s8 }
  0x42   : > { %p713_p9 = pnand %p711_p2, %p667_p5  ;;  %p719_p3 = scmp.lt.s32.totalorder %s717_s15, %s710_s3 }
  0x44   : > { %p714_p11 = pneg %p713_p9  ;;  %p720_p6 = por %p719_p3, %p718_p8 }
  0x46   : > { %p721_p4 = pnand %p720_p6, %p714_p11 }
  0x48   : > { %724 = shalt.err (!%p721_p4)
}
  0x49   : > { %s815_s18 = smov 512   ;;  %s816_s4 = smov 32  }
  0x4a   : > { %606 = dma.hbm_to_vmem [thread:$0]  (!%p913_p0), %s958_s16, 2048, %s960_s19, %s164_s30, %s815_s18, %s815_s18, %s816_s4  }
  0x4b   : > { %191 = sbr.rel (%p949_p7) target bundleno = 332 (0x14c), region = 28  ;;  %s991_s6 = sand.u32 (!%p949_p7), 1, %s795_s10  }
  0x4c   : > { %s566_s20 = sshll.u32 (!%p949_p7), %s991_s6, 1  ;;  %s194_s26 = scalar_lea.sflag (!%p949_p7), [#allocation3], %s991_s6 }
  0x4d   : > { %s995_s27 = scalar_lea.vmem (!%p949_p7), [#allocation2], %s566_s20  ;;  %p1093_p8 = scmp.ne.s32.totalorder (!%p949_p7), %s1086_s21, 0 }
  0x52   : > { %778 = dma.done.wait (%p1093_p8), %s194_s26, 32  }
  0x53   : > { %780 = vsyncadd (%p1093_p8), %s194_s26, 4294967264  ;;  %s567_s25 = sshll.u32 %s991_s6, 7  ;;  %s203_s5 = scalar_lea.sflag [#allocation6], %s991_s6 }
  0x54   : > { %s1003_s29 = scalar_lea.vmem [#allocation5], %s567_s25 }
  0x55   : > { %782 = dma.done.wait (%p1093_p8), %s203_s5, 2048  }
  0x56   : > { %784 = vsyncadd (%p1093_p8), %s203_s5, 4294965248  ;;  %v817_v0 = vmov 0.0   ;;  %v244_v1 = vld [vmem:[%s1003_s29 + $0x8] sm:$0xff]  ;;  %v246_v3 = vld [vmem:[%s1003_s29 + $0x18] sm:$0xff]  ;;  %vm259_vm0 = vcmask 261120   ;;  %v414_v28 = vlaneseq  ;;  %s568_s21 = sshll.u32 %s991_s6, 3 }
  0x57   : > { %327 = vmatprep.mubr.f32.mxu0 %v817_v0  ;;  %398 = vmatprep.mubr.f32.mxu1 %v817_v0  ;;  %v248_v2 = vld [vmem:[%s1003_s29 + $0x28] sm:$0xff]  ;;  %v250_v5 = vld [vmem:[%s1003_s29 + $0x38] sm:$0xff]  ;;  %v243_v6 = vld [vmem:[%s1003_s29] sm:$0xff]  ;;  %v818_v26 = vmov 1983009808   ;;  %s577_s16 = sshll.u32 %s803_s12, 7 }
  0x58   : > { %v578_v4 = vpack.c.bf16 %v248_v2, %v244_v1  ;;  %v247_v7 = vld [vmem:[%s1003_s29 + $0x20] sm:$0xff]  ;;  %v586_v8 = vpack.c.bf16 %v250_v5, %v246_v3  ;;  %v245_v10 = vld [vmem:[%s1003_s29 + $0x10] sm:$0xff]  ;;  %v252_v12 = vld [vmem:[%s1003_s29 + $0x48] sm:$0xff]  ;;  %v412_v27 = vunpack.c.l.s4 %v818_v26  ;;  %v415_v30 = vshrl.u32 %v414_v28, 7  ;;  %s231_s19 = scalar_lea.vmem [#allocation7], %s568_s21  ;;  %s1031_s7 = scalar_lea.hbm %s1082_s2, %s577_s16 }
  0x59   : > { %v580_v9 = vpack.c.bf16 %v247_v7, %v243_v6  ;;  %v249_v11 = vld [vmem:[%s1003_s29 + $0x30] sm:$0xff]  ;;  %v256_v14 = vld [vmem:[%s1003_s29 + $0x68] sm:$0xff]  ;;  %v254_v15 = vld [vmem:[%s1003_s29 + $0x58] sm:$0xff]  ;;  %s445_s30 = sshll.u32 %s231_s19, 4  ;;  %s430_s8 = scalar_lea.sflag [#allocation4], %s991_s6  ;;  %s1033_s30 = int_to_ptr.vmem [resolvable:$true] %s445_s30 }
  0x5a   : > { %579 = vmatprep.subr.bf16.mxu0 %v578_v4  ;;  %v588_v13 = vpack.c.bf16 %v249_v11, %v245_v10  ;;  %v258_v16 = vld [vmem:[%s1003_s29 + $0x78] sm:$0xff]  ;;  %587 = vmatprep.subr.bf16.mxu1 %v586_v8  ;;  %v582_v17 = vpack.c.bf16 %v256_v14, %v252_v12  ;;  %v251_v19 = vld [vmem:[%s1003_s29 + $0x40] sm:$0xff]  ;;  %v253_v21 = vld [vmem:[%s1003_s29 + $0x50] sm:$0xff]  ;;  %v413_v29 = vunpack.c.0.s8 %v412_v27  ;;  %s725_s15 = scalar_lea.vmem %s1033_s30, 128  ;;  %p1094_p5 = scmp.ne.s32.totalorder %s1087_s22, 0 }
  0x5b   : > { %581 = vmatpush1.bf16.msra.mxu0 %v580_v9  ;;  %v590_v18 = vpack.c.bf16 %v258_v16, %v254_v15  ;;  %v255_v20 = vld [vmem:[%s1003_s29 + $0x60] sm:$0xff]  ;;  %v257_v23 = vld [vmem:[%s1003_s29 + $0x70] sm:$0xff]  ;;  %v242_v25 = vld [vmem:[%s995_s27] sm:$0x3]  ;;  %p726_p0 = scmp.ne.s32.totalorder %s1033_s30, %s725_s15  ;;  %s819_s12 = smov [#allocation7]  }
  0x5c   : > { %589 = vmatpush1.bf16.msra.mxu1 %v588_v13  ;;  %v584_v22 = vpack.c.bf16 %v255_v20, %v251_v19  ;;  %583 = vmatprep.subr.bf16.mxu0 %v582_v17  ;;  %v592_v24 = vpack.c.bf16 %v257_v23, %v253_v21  ;;  %v416_v32 = vsub.s32 %v413_v29, %v415_v30  ;;  %s729_s18 = sshll.u32 %s819_s12, 4  ;;  %s730_s18 = int_to_ptr.vmem [resolvable:$false] %s729_s18 }
  0x5d   : > { %591 = vmatprep.subr.bf16.mxu1 %v590_v18  ;;  %p727_p7 = pnand %p726_p0, %p1094_p5  ;;  %s731_s4 = scalar_lea.vmem %s730_s18, 256 }
  0x5e   : > { %p732_p10 = scmp.lt.s32.totalorder %s1033_s30, %s730_s18  ;;  %p733_p12 = scmp.lt.s32.totalorder %s731_s4, %s725_s15 }
  0x5f   : > { %585 = vmatpush1.bf16.msra.mxu0 %v584_v22  ;;  %p728_p13 = pneg %p727_p7 }
  0x60   : > { %593 = vmatpush1.bf16.msra.mxu1 %v592_v24  ;;  %p734_p1 = por %p733_p12, %p732_p10 }
  0x62   : > { %569 = vmatmul.mubr.msk.f32.vlgmr.msra.gmra.mrb[0].mxu0 %vm259_vm0, %v242_v25  ;;  %p735_p2 = pnand %p734_p1, %p728_p13 }
  0x63   : > { %570 = vmatmul.mubr.msk.f32.vlgmr.msra.gmra.mrb[0].mxu1 %vm259_vm0, %v242_v25 }
 0x135   : > { %v329_v31 = vpop.f32.mrb[0].mxu0 }
 0x136   : > { %v400_v33 = vpop.f32.mrb[0].mxu1  ;;  %v331_v34 = vpop.f32.mrb[1].mxu0 }
 0x137   : > { %v409_v35 = vcombine.low %v329_v31, %v331_v34  ;;  %v402_v36 = vpop.f32.mrb[1].mxu1 }
 0x138   : > { %v410_v37 = vcombine.low %v400_v33, %v402_v36 }
 0x139   : > { %v417_v38 = vrot.slane %v409_v35, %v416_v32 }
 0x13a   : > { %v424_v39 = vrot.slane %v410_v37, %v416_v32 }
 0x13c   : > { %v425_v40 = vcombine.low %v417_v38, %v424_v39 }
 0x13e   : > { %428 = vst [vmem:[%s231_s19] sm:$0xff] %v425_v40 }
 0x13f   : > { %738 = shalt.err (!%p735_p2)
}
 0x140   : > { %s739_s6 = scalar_lea.hbm %s1031_s7, 128  ;;  %s743_s27 = scalar_lea.hbm %s1082_s2, 256 }
 0x141   : > { %p740_p9 = scmp.ne.s32.totalorder %s1031_s7, %s739_s6  ;;  %p744_p6 = scmp.lt.u32.totalorder %s1031_s7, %s1082_s2 }
 0x142   : > { %p745_p4 = scmp.lt.u32.totalorder %s743_s27, %s739_s6  ;;  %p747_p0 = scmp.lt.u32.totalorder %s739_s6, %s1031_s7 }
 0x143   : > { %p741_p11 = pnand %p740_p9, %p1094_p5 }
 0x144   : > { %p746_p8 = por %p745_p4, %p744_p6 }
 0x145   : > { %p742_p3 = pneg %p741_p11 }
 0x146   : > { %p748_p7 = por %p747_p0, %p746_p8 }
 0x148   : > { %p749_p13 = pnand %p748_p7, %p742_p3 }
 0x14a   : > { %752 = shalt.err (!%p749_p13)
}
 0x14b   : > { %598 = dma.vmem_to_hbm [thread:$0]  (%p1094_p5), %s1033_s30, 128, %s1031_s7, %s430_s8  }
 0x14c PF: > { %s457_s29 = sand.u32 1, %s791_s9   ;;  %p1095_p10 = scmp.ne.s32.totalorder %s1088_s24, 0 }
 0x14d   : > { %p1096_p12 = scmp.ge.s32.totalorder %s811_s14, 2  ;;  %s458_s21 = scalar_lea.sflag [#allocation4], %s457_s29 }
 0x14f   : > { %p608_p1 = pnand %p1096_p12, %p1095_p10 }
 0x151   : > { %786 = dma.done.wait (!%p608_p1), %s458_s21, 128  }
 0x152   : > { %788 = vsyncadd (!%p608_p1), %s458_s21, 4294967168  ;;  %s21_s14 = sadd.s32 1, %s811_s14   ;;  %s1097_s9 = smov %s795_s10 }
 0x153   : > { %p18_p2 = scmp.ge.s32.totalorder %s21_s14, 4   ;;  %s1098_s10 = smov %s799_s11 }
 0x154   : > { %s1099_s11 = smov %s891_s23  ;;  %s1100_s12 = smov %s807_s13 }
 0x155   : > { %s1101_s13 = smov %s1103_s17  ;;  %20 = sbr.rel (!%p18_p2) target bundleno = 8 (0x8), region = 90 }
 0x15c   :  { %463 = vsyncpa [#allocation3], 1 }
 0x15d   :  { %465 = vsyncpa [#allocation3 + $0x1], 1 }
 0x15e   :  { %466 = vsyncpa [#allocation6], 1 }
 0x15f   :  { %468 = vsyncpa [#allocation6 + $0x1], 1 }
 0x160   :  { %469 = vsyncpa [#allocation4], 1 }
 0x161   :  { %471 = vsyncpa [#allocation4 + $0x1], 1 }

</bundles_post_ra>
